<compile_context>
chip_gen: v7x
topology: tpu7x:2x2x1
jax: 0.10.0
libtpu: 0.0.40
codegen_flags: <defaults>
</compile_context>

<pallas_src>
import math

import jax
import jax.numpy as jnp
from jax.experimental import pallas as pl
from jax.experimental.pallas import tpu as pltpu


_NEG_BIG = -1e30   # bias for padded action lanes -> exp() underflows to 0.0
_LANE = 128


def discrete_policy_kernel(x_ref, w1_ref, b1_ref, w2_ref, b2_ref,
                           w3_ref, b3_ref, out_ref):
    # In-kernel bf16 cast of the activations (free VPU op, hidden under DMA/MXU).
    x_bf = x_ref[...].astype(jnp.bfloat16)
    # Hidden layer 1: tanh(x @ W1 + b1)   (bf16 MXU inputs, f32 accumulate)
    h = jnp.tanh(
        jnp.dot(x_bf, w1_ref[...], preferred_element_type=jnp.float32)
        + b1_ref[...]
    )
    # Hidden layer 2: tanh(h @ W2 + b2)
    h = jnp.tanh(
        jnp.dot(h.astype(jnp.bfloat16), w2_ref[...],
                preferred_element_type=jnp.float32)
        + b2_ref[...]
    )
    # Action head logits (lane-padded to 128; padded lanes carry -1e30 bias).
    logits = (
        jnp.dot(h.astype(jnp.bfloat16), w3_ref[...],
                preferred_element_type=jnp.float32)
        + b3_ref[...]
    )
    # Numerically stable softmax over the action (lane) dimension.
    m = jnp.max(logits, axis=-1, keepdims=True)
    e = jnp.exp(logits - m)                        # padded lanes -> exactly 0
    denom = jnp.sum(e, axis=-1, keepdims=True)
    out_ref[...] = (e * pl.reciprocal(denom, approx=True)).astype(out_ref.dtype)


def _round_up(n, m):
    return ((n + m - 1) // m) * m


def _choose_tiling(B, max_tile):
    """Pick (TB, B_pad, num_tiles).

    * TB is a multiple of 16 rows (bf16 sublane packing).
    * >= 2 grid steps whenever the batch is big enough, so the "parallel"
      batch axis can shard across both TensorCores on v7x.
    * TB capped by max_tile purely to amortize ~0.35 us per-grid-step overhead
      (this kernel is overhead/HBM-bound, not MXU- or VMEM-bound).
    """
    B16 = _round_up(max(B, 1), 16)
    if B16 <= 32:                      # tiny batch: splitting is pure overhead
        return B16, B16, 1
    TB = min(_round_up(max_tile, 16), _round_up(pl.cdiv(B16, 2), 16))
    B_pad = _round_up(B16, TB)
    return TB, B_pad, B_pad // TB


def _const2d(i):
    return (0, 0)


def _const_param_spec(shape):
    """Grid-invariant operand: constant index_map, single-buffered."""
    try:
        return pl.BlockSpec(shape, _const2d, pipeline_mode=pl.Buffered(1))
    except TypeError:   # older Pallas without pipeline_mode: default buffering
        return pl.BlockSpec(shape, _const2d)


def prepare_params(params):
    """One-time (per parameter update) preparation of kernel operands:
    bf16 weight casts, f32 biases as [1, out], action-head lane padding."""
    w1, b1, w2, b2, w3, b3 = (params[k] for k in ("w1", "b1", "w2", "b2", "w3", "b3"))
    A = w3.shape[1]
    A_pad = _round_up(A, _LANE)
    return {
        "w1": w1.astype(jnp.bfloat16),
        "b1": b1.astype(jnp.float32).reshape(1, -1),
        "w2": w2.astype(jnp.bfloat16),
        "b2": b2.astype(jnp.float32).reshape(1, -1),
        "w3": jnp.pad(w3.astype(jnp.bfloat16), ((0, 0), (0, A_pad - A))),
        "b3": jnp.pad(b3.astype(jnp.float32).reshape(1, -1),
                      ((0, 0), (0, A_pad - A)), constant_values=_NEG_BIG),
        "action_num": A,
    }


def discrete_policy_forward(x, prepared, *, batch_tile=1024,
                            out_dtype=jnp.bfloat16, trim=True):
    """x: [B, state_dim] f32. prepared: output of prepare_params().
    Returns action probabilities [B, action_num] (out_dtype), or the padded
    [B_pad, 128] array if trim=False (skips the wrapper slice copy)."""
    w1, b1, w2, b2, w3, b3 = (prepared[k] for k in ("w1", "b1", "w2", "b2", "w3", "b3"))
    A = prepared["action_num"]
    A_pad = w3.shape[1]
    B, S = x.shape

    TB, B_pad, num_tiles = _choose_tiling(B, batch_tile)

    # Only a batch pad (f32); the bf16 cast happens inside the kernel.
    x_p = x if B_pad == B else jnp.pad(x, ((0, B_pad - B), (0, 0)))

    out = pl.pallas_call(
        discrete_policy_kernel,
        out_shape=jax.ShapeDtypeStruct((B_pad, A_pad), out_dtype),
        grid=(num_tiles,),
        in_specs=[
            pl.BlockSpec((TB, S), lambda i: (i, 0)),   # x: tiled on batch
            _const_param_spec(w1.shape),
            _const_param_spec(b1.shape),
            _const_param_spec(w2.shape),
            _const_param_spec(b2.shape),
            _const_param_spec(w3.shape),
            _const_param_spec(b3.shape),
        ],
        out_specs=pl.BlockSpec((TB, A_pad), lambda i: (i, 0)),
        compiler_params=pltpu.CompilerParams(
            dimension_semantics=("parallel",)),
    )(x_p, w1, b1, w2, b2, w3, b3)

    if trim:
        return out[:B, :A]
    return out


def init_params(key, state_dim, action_num, hidden_size=(128, 128)):
    """Deterministic init mimicking PyTorch nn.Linear defaults
    (uniform(-1/sqrt(fan_in), 1/sqrt(fan_in))), with action_head weight *0.1
    and bias zeroed, as in the module's __init__."""
    ks = jax.random.split(key, 6)
    dims = [state_dim] + list(hidden_size)

    def linear(kw, kb, fan_in, fan_out):
        bound = 1.0 / math.sqrt(fan_in)
        w = jax.random.uniform(kw, (fan_in, fan_out), jnp.float32, -bound, bound)
        b = jax.random.uniform(kb, (1, fan_out), jnp.float32, -bound, bound)
        return w, b

    w1, b1 = linear(ks[0], ks[1], dims[0], dims[1])
    w2, b2 = linear(ks[2], ks[3], dims[1], dims[2])
    w3, b3 = linear(ks[4], ks[5], dims[2], action_num)
    w3 = w3 * 0.1          # action_head.weight.data.mul_(0.1)
    b3 = b3 * 0.0          # action_head.bias.data.mul_(0.0)
    return {"w1": w1, "b1": b1, "w2": w2, "b2": b2, "w3": w3, "b3": b3}


def reference_forward(x, p):
    """Pure-JAX f32 reference matching the PyTorch forward."""
    h = jnp.tanh(x @ p["w1"] + p["b1"])
    h = jnp.tanh(h @ p["w2"] + p["b2"])
    logits = h @ p["w3"] + p["b3"]
    return jax.nn.softmax(logits, axis=1)


if __name__ == "__main__":
    key = jax.random.PRNGKey(0)
    k_param, k_x1, k_x2 = jax.random.split(key, 3)

    state_dim = 16
    action_num = 6
    hidden = (128, 128)

    params = init_params(k_param, state_dim, action_num, hidden)
    prepared = prepare_params(params)   # one-time bf16 cast + lane padding

    # Small batch: collapses to a single 16-row tile.
    x_small = jax.random.normal(k_x1, (8, state_dim), dtype=jnp.float32)
    out_small = jax.block_until_ready(discrete_policy_forward(x_small, prepared))
    ref_small = reference_forward(x_small, params)
    assert out_small.shape == (8, action_num)
    out_small_f32 = out_small.astype(jnp.float32)
    assert jnp.allclose(out_small_f32, ref_small, atol=1e-2, rtol=5e-2), "small-batch mismatch"
    assert jnp.allclose(jnp.sum(out_small_f32, axis=1), 1.0, atol=2e-2)

    # Ragged larger batch: exercises the tiled grid (2 parallel steps).
    x_big = jax.random.normal(k_x2, (200, state_dim), dtype=jnp.float32)
    out_big = jax.block_until_ready(discrete_policy_forward(x_big, prepared))
    ref_big = reference_forward(x_big, params)
    assert out_big.shape == (200, action_num)
    out_big_f32 = out_big.astype(jnp.float32)
    assert jnp.allclose(out_big_f32, ref_big, atol=1e-2, rtol=5e-2), "tiled-batch mismatch"
    assert jnp.allclose(jnp.sum(out_big_f32, axis=1), 1.0, atol=2e-2)

    print("KERNEL_OK")
</pallas_src>

<mosaic_0001>
module attributes {stable_mosaic.version = 11 : i64} {
  func.func @discrete_policy_kernel(%arg0: i32, %arg1: memref<16x16xf32, #tpu.memory_space<vmem>>, %arg2: memref<16x128xbf16, #tpu.memory_space<vmem>>, %arg3: memref<1x128xf32, #tpu.memory_space<vmem>>, %arg4: memref<128x128xbf16, #tpu.memory_space<vmem>>, %arg5: memref<1x128xf32, #tpu.memory_space<vmem>>, %arg6: memref<128x128xbf16, #tpu.memory_space<vmem>>, %arg7: memref<1x128xf32, #tpu.memory_space<vmem>>, %arg8: memref<16x128xbf16, #tpu.memory_space<vmem>>) attributes {dimension_semantics = [#tpu.dimension_semantics<parallel>], iteration_bounds = array<i64: 1>, scalar_prefetch = 0 : i64, scratch_operands = 0 : i64, tpu.core_type = #tpu.core_type<tc>, window_params = [{transform_indices = @transform_0, window_bounds = array<i64: 16, 16>}, {pipeline_mode = #tpu.pipeline_mode<synchronous>, transform_indices = @transform_1, window_bounds = array<i64: 16, 128>}, {pipeline_mode = #tpu.pipeline_mode<synchronous>, transform_indices = @transform_2, window_bounds = array<i64: 1, 128>}, {pipeline_mode = #tpu.pipeline_mode<synchronous>, transform_indices = @transform_3, window_bounds = array<i64: 128, 128>}, {pipeline_mode = #tpu.pipeline_mode<synchronous>, transform_indices = @transform_4, window_bounds = array<i64: 1, 128>}, {pipeline_mode = #tpu.pipeline_mode<synchronous>, transform_indices = @transform_5, window_bounds = array<i64: 128, 128>}, {pipeline_mode = #tpu.pipeline_mode<synchronous>, transform_indices = @transform_6, window_bounds = array<i64: 1, 128>}, {transform_indices = @transform_7, window_bounds = array<i64: 16, 128>}]} {
    %c0 = arith.constant 0 : index
    %c0_0 = arith.constant 0 : index
    %0 = vector.load %arg1[%c0, %c0_0] : memref<16x16xf32, #tpu.memory_space<vmem>>, vector<16x16xf32>
    %1 = arith.truncf %0 : vector<16x16xf32> to vector<16x16xbf16>
    %c0_1 = arith.constant 0 : index
    %c0_2 = arith.constant 0 : index
    %2 = vector.load %arg2[%c0_1, %c0_2] : memref<16x128xbf16, #tpu.memory_space<vmem>>, vector<16x128xbf16>
    %cst = arith.constant dense<0.000000e+00> : vector<16x128xf32>
    %3 = tpu.matmul %1, %2, %cst {dimension_numbers = #tpu.dot_dimension_numbers<[1], [0], [0], [1], [0, 0, 1, 1], [], []>} : vector<16x16xbf16>, vector<16x128xbf16>, vector<16x128xf32> -> vector<16x128xf32>
    %c0_3 = arith.constant 0 : index
    %c0_4 = arith.constant 0 : index
    %4 = vector.load %arg3[%c0_3, %c0_4] : memref<1x128xf32, #tpu.memory_space<vmem>>, vector<1x128xf32>
    %5 = vector.broadcast %4 : vector<1x128xf32> to vector<16x128xf32>
    %6 = arith.addf %3, %5 : vector<16x128xf32>
    %7 = math.tanh %6 : vector<16x128xf32>
    %8 = arith.truncf %7 : vector<16x128xf32> to vector<16x128xbf16>
    %c0_5 = arith.constant 0 : index
    %c0_6 = arith.constant 0 : index
    %9 = vector.load %arg4[%c0_5, %c0_6] : memref<128x128xbf16, #tpu.memory_space<vmem>>, vector<128x128xbf16>
    %cst_7 = arith.constant dense<0.000000e+00> : vector<16x128xf32>
    %10 = tpu.matmul %8, %9, %cst_7 {dimension_numbers = #tpu.dot_dimension_numbers<[1], [0], [0], [1], [0, 0, 1, 1], [], []>} : vector<16x128xbf16>, vector<128x128xbf16>, vector<16x128xf32> -> vector<16x128xf32>
    %c0_8 = arith.constant 0 : index
    %c0_9 = arith.constant 0 : index
    %11 = vector.load %arg5[%c0_8, %c0_9] : memref<1x128xf32, #tpu.memory_space<vmem>>, vector<1x128xf32>
    %12 = vector.broadcast %11 : vector<1x128xf32> to vector<16x128xf32>
    %13 = arith.addf %10, %12 : vector<16x128xf32>
    %14 = math.tanh %13 : vector<16x128xf32>
    %15 = arith.truncf %14 : vector<16x128xf32> to vector<16x128xbf16>
    %c0_10 = arith.constant 0 : index
    %c0_11 = arith.constant 0 : index
    %16 = vector.load %arg6[%c0_10, %c0_11] : memref<128x128xbf16, #tpu.memory_space<vmem>>, vector<128x128xbf16>
    %cst_12 = arith.constant dense<0.000000e+00> : vector<16x128xf32>
    %17 = tpu.matmul %15, %16, %cst_12 {dimension_numbers = #tpu.dot_dimension_numbers<[1], [0], [0], [1], [0, 0, 1, 1], [], []>} : vector<16x128xbf16>, vector<128x128xbf16>, vector<16x128xf32> -> vector<16x128xf32>
    %c0_13 = arith.constant 0 : index
    %c0_14 = arith.constant 0 : index
    %18 = vector.load %arg7[%c0_13, %c0_14] : memref<1x128xf32, #tpu.memory_space<vmem>>, vector<1x128xf32>
    %19 = vector.broadcast %18 : vector<1x128xf32> to vector<16x128xf32>
    %20 = arith.addf %17, %19 : vector<16x128xf32>
    %cst_15 = arith.constant dense<0xFF800000> : vector<16xf32>
    %21 = vector.multi_reduction <maximumf>, %20, %cst_15 [1] : vector<16x128xf32> to vector<16xf32>
    %22 = vector.shape_cast %21 : vector<16xf32> to vector<16x1xf32>
    %23 = vector.broadcast %22 : vector<16x1xf32> to vector<16x128xf32>
    %24 = arith.subf %20, %23 : vector<16x128xf32>
    %25 = math.exp %24 : vector<16x128xf32>
    %cst_16 = arith.constant dense<0.000000e+00> : vector<16xf32>
    %26 = vector.multi_reduction <add>, %25, %cst_16 [1] : vector<16x128xf32> to vector<16xf32>
    %27 = vector.shape_cast %26 : vector<16xf32> to vector<16x1xf32>
    %28 = tpu.reciprocal %27 {approx = true} : vector<16x1xf32> -> vector<16x1xf32>
    %29 = vector.broadcast %28 : vector<16x1xf32> to vector<16x128xf32>
    %30 = arith.mulf %25, %29 : vector<16x128xf32>
    %31 = arith.truncf %30 : vector<16x128xf32> to vector<16x128xbf16>
    %c0_17 = arith.constant 0 : index
    %c0_18 = arith.constant 0 : index
    %32 = vector.load %arg8[%c0_17, %c0_18] : memref<16x128xbf16, #tpu.memory_space<vmem>>, vector<16x128xbf16>
    tpu.vector_store %arg8[%c0_17, %c0_18], %31 {strides = array<i32>} : memref<16x128xbf16, #tpu.memory_space<vmem>>, vector<16x128xbf16>,
    return
  }
  func.func @transform_0(%arg0: i32) -> (i32, i32) {
    %c0_i32 = arith.constant 0 : i32
    %c0_i32_0 = arith.constant 0 : i32
    return %arg0, %c0_i32 : i32, i32
  }
  func.func @transform_1(%arg0: i32) -> (i32, i32) {
    %c0_i32 = arith.constant 0 : i32
    %c0_i32_0 = arith.constant 0 : i32
    %c0_i32_1 = arith.constant 0 : i32
    return %c0_i32, %c0_i32_0 : i32, i32
  }
  func.func @transform_2(%arg0: i32) -> (i32, i32) {
    %c0_i32 = arith.constant 0 : i32
    %c0_i32_0 = arith.constant 0 : i32
    %c0_i32_1 = arith.constant 0 : i32
    return %c0_i32, %c0_i32_0 : i32, i32
  }
  func.func @transform_3(%arg0: i32) -> (i32, i32) {
    %c0_i32 = arith.constant 0 : i32
    %c0_i32_0 = arith.constant 0 : i32
    %c0_i32_1 = arith.constant 0 : i32
    return %c0_i32, %c0_i32_0 : i32, i32
  }
  func.func @transform_4(%arg0: i32) -> (i32, i32) {
    %c0_i32 = arith.constant 0 : i32
    %c0_i32_0 = arith.constant 0 : i32
    %c0_i32_1 = arith.constant 0 : i32
    return %c0_i32, %c0_i32_0 : i32, i32
  }
  func.func @transform_5(%arg0: i32) -> (i32, i32) {
    %c0_i32 = arith.constant 0 : i32
    %c0_i32_0 = arith.constant 0 : i32
    %c0_i32_1 = arith.constant 0 : i32
    return %c0_i32, %c0_i32_0 : i32, i32
  }
  func.func @transform_6(%arg0: i32) -> (i32, i32) {
    %c0_i32 = arith.constant 0 : i32
    %c0_i32_0 = arith.constant 0 : i32
    %c0_i32_1 = arith.constant 0 : i32
    return %c0_i32, %c0_i32_0 : i32, i32
  }
  func.func @transform_7(%arg0: i32) -> (i32, i32) {
    %c0_i32 = arith.constant 0 : i32
    %c0_i32_0 = arith.constant 0 : i32
    return %arg0, %c0_i32 : i32, i32
  }
}

</mosaic_0001>

<bundles_post_ra>
// kernel: tpu_custom_call.1
= control target key start
LH: loop header
LB: loop body
LE: loop exit
PB: predicated region body
PF: predicated region fallthrough
CT: control target
= control target key end

     0   :  { %12 = vsyncpa [#allocation3], 0  ;;  %s843_s0 = inlined_call_operand.hbm [shape: f32[16,16], index: 0, kind: input, shape index: {}]   ;;  %s844_s1 = inlined_call_operand.hbm [shape: bf16[16,128], index: 1, kind: input, shape index: {}]   ;;  %s845_s2 = inlined_call_operand.vmem [shape: f32[1,128], index: 2, kind: input, shape index: {}]   ;;  %s846_s3 = inlined_call_operand.hbm [shape: bf16[128,128], index: 3, kind: input, shape index: {}]   ;;  %s847_s4 = inlined_call_operand.vmem [shape: f32[1,128], index: 4, kind: input, shape index: {}]   ;;  %s848_s5 = inlined_call_operand.hbm [shape: bf16[128,128], index: 5, kind: input, shape index: {}]   ;;  %s849_s6 = inlined_call_operand.vmem [shape: f32[1,128], index: 6, kind: input, shape index: {}]   ;;  %s850_s7 = inlined_call_operand.hbm [shape: bf16[16,128], index: 7, kind: output, shape index: {}]  }
   0x1   :  { %13 = vsyncpa [#allocation6], 0 }
   0x2   :  { %14 = vsyncpa [#allocation9], 0 }
   0x3   :  { %15 = vsyncpa [#allocation4], 0  ;;  %s681_s24 = smov [#allocation5]   ;;  %s563_s28 = scalar_lea.hbm %s844_s1, 128 }
   0x4   :  { %s33_s25 = sshll.u32 %s681_s24, 4  ;;  %p564_p0 = scmp.ne.s32.totalorder %s844_s1, %s563_s28  ;;  %s34_s25 = int_to_ptr.vmem [resolvable:$true] %s33_s25 }
   0x5   :  { %p567_p1 = scmp.lt.u32.totalorder %s563_s28, %s844_s1 }
   0x7   :  { %p569_p2 = pnand %p567_p1, %p564_p0 }
   0x9   :  { %572 = shalt.err (!%p569_p2)
}
   0xa   :  { %s573_s10 = scalar_lea.vmem %s34_s25, 128  ;;  %p578_p4 = scmp.lt.s32.totalorder %s34_s25, %s34_s25 }
   0xb   :  { %p574_p3 = scmp.ne.s32.totalorder %s34_s25, %s573_s10  ;;  %p579_p5 = scmp.lt.s32.totalorder %s573_s10, %s573_s10 }
   0xd   :  { %p580_p6 = por %p579_p5, %p578_p4 }
   0xf   :  { %p581_p7 = pnand %p580_p6, %p574_p3 }
  0x11   :  { %584 = shalt.err (!%p581_p7)
}
  0x12   :  { %s682_s11 = smov 64   ;;  %s683_s12 = smov 4  }
  0x13   :  { %39 = dma.hbm_to_vmem [thread:$0]  %s844_s1, 128, %s34_s25, [#allocation6], %s682_s11, %s682_s11, %s683_s12  }
  0x14   :  { %s684_s15 = smov [#allocation2]   ;;  %s585_s19 = scalar_lea.hbm %s843_s0, 256 }
  0x15   :  { %s21_s16 = sshll.u32 %s684_s15, 4  ;;  %p586_p8 = scmp.ne.s32.totalorder %s843_s0, %s585_s19  ;;  %s22_s16 = int_to_ptr.vmem [resolvable:$true] %s21_s16 }
  0x16   :  { %p589_p9 = scmp.lt.u32.totalorder %s585_s19, %s843_s0 }
  0x18   :  { %p591_p10 = pnand %p589_p9, %p586_p8 }
  0x1a   :  { %594 = shalt.err (!%p591_p10)
}
  0x1b   :  { %s595_s24 = scalar_lea.vmem %s22_s16, 256  ;;  %p600_p12 = scmp.lt.s32.totalorder %s22_s16, %s22_s16 }
  0x1c   :  { %p596_p11 = scmp.ne.s32.totalorder %s22_s16, %s595_s24  ;;  %p601_p13 = scmp.lt.s32.totalorder %s595_s24, %s595_s24 }
  0x1e   :  { %p602_p0 = por %p601_p13, %p600_p12 }
  0x20   :  { %p603_p1 = pnand %p602_p0, %p596_p11 }
  0x22   :  { %606 = shalt.err (!%p603_p1)
}
  0x23   :  { %s685_s1 = smov 128   ;;  %s686_s25 = smov 8  }
  0x24   :  { %27 = dma.hbm_to_vmem [thread:$0]  %s843_s0, 256, %s22_s16, [#allocation3], %s685_s1, %s685_s1, %s686_s25  }
  0x25   :  { %s687_s28 = smov [#allocation7]   ;;  %s688_s30 = smov [#allocation8]  }
  0x26   :  { %s47_s29 = sshll.u32 %s687_s28, 4  ;;  %s61_s8 = sshll.u32 %s688_s30, 4  ;;  %s48_s29 = int_to_ptr.vmem [resolvable:$true] %s47_s29  ;;  %s759_s8 = int_to_ptr.vmem [resolvable:$true] %s61_s8 }
  0x27   :  { %s607_s13 = scalar_lea.hbm %s846_s3, 1024 }
  0x28   :  { %p608_p2 = scmp.ne.s32.totalorder %s846_s3, %s607_s13  ;;  %p611_p3 = scmp.lt.u32.totalorder %s607_s13, %s846_s3 }
  0x2a   :  { %p613_p4 = pnand %p611_p3, %p608_p2 }
  0x2c   :  { %616 = shalt.err (!%p613_p4)
}
  0x2d   :  { %s617_s0 = scalar_lea.vmem %s48_s29, 1024  ;;  %p622_p6 = scmp.lt.s32.totalorder %s48_s29, %s48_s29 }
  0x2e   :  { %p618_p5 = scmp.ne.s32.totalorder %s48_s29, %s617_s0  ;;  %p623_p7 = scmp.lt.s32.totalorder %s617_s0, %s617_s0 }
  0x30   :  { %p624_p8 = por %p623_p7, %p622_p6 }
  0x32   :  { %p625_p9 = pnand %p624_p8, %p618_p5 }
  0x34   :  { %628 = shalt.err (!%p625_p9)
}
  0x35   :  { %53 = dma.hbm_to_vmem [thread:$0]  %s846_s3, 1024, %s48_s29, [#allocation6], %s682_s11, %s682_s11, %s683_s12  }
  0x36   :  { %s629_s22 = scalar_lea.hbm %s848_s5, 1024 }
  0x37   :  { %p630_p10 = scmp.ne.s32.totalorder %s848_s5, %s629_s22  ;;  %p633_p11 = scmp.lt.u32.totalorder %s629_s22, %s848_s5 }
  0x39   :  { %p635_p12 = pnand %p633_p11, %p630_p10 }
  0x3b   :  { %638 = shalt.err (!%p635_p12)
}
  0x3c   :  { %s639_s26 = scalar_lea.vmem %s759_s8, 1024  ;;  %p644_p0 = scmp.lt.s32.totalorder %s759_s8, %s759_s8 }
  0x3d   :  { %p640_p13 = scmp.ne.s32.totalorder %s759_s8, %s639_s26  ;;  %p645_p1 = scmp.lt.s32.totalorder %s639_s26, %s639_s26 }
  0x3f   :  { %p646_p2 = por %p645_p1, %p644_p0 }
  0x41   :  { %p647_p3 = pnand %p646_p2, %p640_p13 }
  0x43   :  { %650 = shalt.err (!%p647_p3)
}
  0x44   :  { %67 = dma.hbm_to_vmem [thread:$0]  %s848_s5, 1024, %s759_s8, [#allocation9], %s682_s11, %s682_s11, %s683_s12  }
  0x45   :  { %673 = dma.done.wait [#allocation3], 256  }
  0x46   :  { %674 = vsyncadd [#allocation3], 4294967040 }
  0x47   :  { %675 = dma.done.wait [#allocation6], 1152  }
  0x48   :  { %676 = vsyncadd [#allocation6], 4294966144 }
  0x49   :  { %677 = dma.done.wait [#allocation9], 1024  }
  0x4a   :  { %678 = vsyncadd [#allocation9], 4294966272  ;;  %v689_v0 = vmov 0.0   ;;  %vm690_vm0 = vmmov 0   ;;  %v530_v1 = vld [vmem:[#allocation5] sm:$0xff]   ;;  %v83_v2 = vld [vmem:[#allocation2] sm:$0xff] }
  0x4b   :  { %473 = vmatprep.subr.bf16.mxu0 %v689_v0  ;;  %475 = vmatprep.mubr.msk.bf16.mxu0 %vm690_vm0, %v689_v0  ;;  %v84_v3 = vld [vmem:[#allocation2 + $0x8] sm:$0xff]  ;;  %vm101_vm1 = vcmask 130048   ;;  %v531_v5 = vld [vmem:[#allocation7] sm:$0xff]   ;;  %v532_v6 = vld [vmem:[#allocation7 + $0x8] sm:$0xff]  }
  0x4c   :  { %479 = vmatprep.subr.bf16.mxu1 %v689_v0  ;;  %495 = vmatprep.mubr.msk.bf16.mxu1 %vm690_vm0, %v689_v0  ;;  %v85_v4 = vpack.c.bf16 %v84_v3, %v83_v2  ;;  %v533_v7 = vld [vmem:[#allocation7 + $0x10] sm:$0xff]   ;;  %v534_v8 = vld [vmem:[#allocation7 + $0x18] sm:$0xff]   ;;  %v535_v9 = vld [vmem:[#allocation7 + $0x20] sm:$0xff]  }
  0x4d   :  { %474 = vmatpush3.bf16.msra.mxu0 %v530_v1  ;;  %480 = vmatpush3.bf16.msra.mxu1 %v531_v5  ;;  %v536_v10 = vld [vmem:[#allocation7 + $0x28] sm:$0xff]   ;;  %v537_v11 = vld [vmem:[#allocation7 + $0x30] sm:$0xff]   ;;  %v538_v12 = vld [vmem:[#allocation7 + $0x38] sm:$0xff]  }
  0x4e   :  { %499 = vmatprep.subr.bf16.mxu0 %v689_v0  ;;  %481 = vmatprep.subr.bf16.mxu1 %v689_v0  ;;  %v539_v13 = vld [vmem:[#allocation8] sm:$0xff]   ;;  %v540_v14 = vld [vmem:[#allocation8 + $0x8] sm:$0xff]   ;;  %v541_v15 = vld [vmem:[#allocation8 + $0x10] sm:$0xff]  }
  0x4f   :  { %v542_v16 = vld [vmem:[#allocation8 + $0x18] sm:$0xff]   ;;  %v423_v17 = vld [vmem:[%s845_s2] ss:$0 sm:$0xff]  ;;  %v543_v27 = vld [vmem:[#allocation8 + $0x20] sm:$0xff]  }
  0x50   :  { %476 = vmatmul.mubr.msk.bf16.vlgmr.msra.gmra.mrb[0].mxu0 %vm101_vm1, %v85_v4  ;;  %v544_v28 = vld [vmem:[#allocation8 + $0x28] sm:$0xff]   ;;  %v545_v29 = vld [vmem:[#allocation8 + $0x30] sm:$0xff]   ;;  %v546_v30 = vld [vmem:[#allocation8 + $0x38] sm:$0xff]  }
  0x51   :  { %515 = vmatprep.mubr.msk.bf16.mxu0 %vm690_vm0, %v689_v0  ;;  %482 = vmatpush3.bf16.msra.mxu1 %v532_v6  ;;  %v426_v31 = vld [vmem:[%s847_s4] ss:$0 sm:$0xff]  ;;  %s691_s4 = smov [#allocation10]  }
  0x52   :  { %483 = vmatprep.subr.bf16.mxu1 %v689_v0  ;;  %500 = vmatpush3.bf16.msra.mxu0 %v539_v13  ;;  %v435_v41 = vld [vmem:[%s849_s6] ss:$0 sm:$0xff]  ;;  %s409_s6 = sshll.u32 %s691_s4, 4  ;;  %s410_s6 = int_to_ptr.vmem [resolvable:$true] %s409_s6 }
  0x53   :  { %501 = vmatprep.subr.bf16.mxu0 %v689_v0  ;;  %s651_s9 = scalar_lea.vmem %s410_s6, 128  ;;  %p656_p5 = scmp.lt.s32.totalorder %s410_s6, %s410_s6 }
  0x54   :  { %p652_p4 = scmp.ne.s32.totalorder %s410_s6, %s651_s9  ;;  %p657_p6 = scmp.lt.s32.totalorder %s651_s9, %s651_s9 }
  0x55   :  { %484 = vmatpush3.bf16.msra.mxu1 %v533_v7 }
  0x56   :  { %485 = vmatprep.subr.bf16.mxu1 %v689_v0  ;;  %502 = vmatpush3.bf16.msra.mxu0 %v540_v14  ;;  %p658_p7 = por %p657_p6, %p656_p5 }
  0x57   :  { %503 = vmatprep.subr.bf16.mxu0 %v689_v0 }
  0x58   :  { %p659_p8 = pnand %p658_p7, %p652_p4 }
  0x59   :  { %486 = vmatpush3.bf16.msra.mxu1 %v534_v8 }
  0x5a   :  { %487 = vmatprep.subr.bf16.mxu1 %v689_v0  ;;  %504 = vmatpush3.bf16.msra.mxu0 %v541_v15 }
  0x5b   :  { %505 = vmatprep.subr.bf16.mxu0 %v689_v0 }
  0x5d   :  { %488 = vmatpush3.bf16.msra.mxu1 %v535_v9 }
  0x5e   :  { %489 = vmatprep.subr.bf16.mxu1 %v689_v0  ;;  %506 = vmatpush3.bf16.msra.mxu0 %v542_v16 }
  0x5f   :  { %507 = vmatprep.subr.bf16.mxu0 %v689_v0 }
  0x61   :  { %490 = vmatpush3.bf16.msra.mxu1 %v536_v10 }
  0x62   :  { %491 = vmatprep.subr.bf16.mxu1 %v689_v0  ;;  %508 = vmatpush3.bf16.msra.mxu0 %v543_v27 }
  0x63   :  { %509 = vmatprep.subr.bf16.mxu0 %v689_v0 }
  0x65   :  { %492 = vmatpush3.bf16.msra.mxu1 %v537_v11 }
  0x66   :  { %493 = vmatprep.subr.bf16.mxu1 %v689_v0  ;;  %510 = vmatpush3.bf16.msra.mxu0 %v544_v28 }
  0x67   :  { %511 = vmatprep.subr.bf16.mxu0 %v689_v0 }
  0x69   :  { %494 = vmatpush3.bf16.msra.mxu1 %v538_v12 }
  0x6a   :  { %512 = vmatpush3.bf16.msra.mxu0 %v545_v29 }
  0x6b   :  { %513 = vmatprep.subr.bf16.mxu0 %v689_v0 }
  0x6e   :  { %514 = vmatpush3.bf16.msra.mxu0 %v546_v30 }
 0x123   :  { %v139_v18 = vpop.f32.mrb[0].mxu0 }
 0x124   :  { %v140_v19 = vadd.f32 %v423_v17, %v139_v18  ;;  %v477_v20 = vpop.f32.mrb[1].mxu0 }
 0x125   :  { %v142_v21 = vpop.f32.mrb[2].mxu0 }
 0x126   :  { %v143_v22 = vadd.f32 %v423_v17, %v142_v21  ;;  %v478_v23 = vpop.f32.mrb[3].mxu0  ;;  %547 = vtanh.f32 %v140_v19 }
 0x128   :  { %549 = vtanh.f32 %v143_v22 }
 0x130   :  { %v548_v24 = vpop.eup %547 }
 0x132   :  { %v550_v25 = vpop.eup %549 }
 0x133   :  { %v148_v26 = vpack.c.bf16 %v550_v25, %v548_v24 }
 0x135   :  { %496 = vmatmul.mubr.bf16.vlgmr.msra.gmra.mrb[0].mxu1 %v148_v26 }
 0x208   :  { %v254_v32 = vpop.f32.mrb[0].mxu1 }
 0x209   :  { %v255_v33 = vadd.f32 %v426_v31, %v254_v32  ;;  %v497_v34 = vpop.f32.mrb[1].mxu1 }
 0x20a   :  { %v257_v35 = vpop.f32.mrb[2].mxu1 }
 0x20b   :  { %v258_v36 = vadd.f32 %v426_v31, %v257_v35  ;;  %v498_v37 = vpop.f32.mrb[3].mxu1  ;;  %551 = vtanh.f32 %v255_v33 }
 0x20d   :  { %553 = vtanh.f32 %v258_v36 }
 0x215   :  { %v552_v38 = vpop.eup %551 }
 0x217   :  { %v554_v39 = vpop.eup %553 }
 0x218   :  { %v263_v40 = vpack.c.bf16 %v554_v39, %v552_v38 }
 0x21a   :  { %516 = vmatmul.mubr.bf16.vlgmr.msra.gmra.mrb[4].mxu0 %v263_v40 }
 0x2ed   :  { %v369_v42 = vpop.f32.mrb[4].mxu0 }
 0x2ee   :  { %v370_v43 = vadd.f32 %v435_v41, %v369_v42  ;;  %v517_v44 = vpop.f32.mrb[5].mxu0 }
 0x2ef   :  { %v372_v45 = vpop.f32.mrb[6].mxu0 }
 0x2f0   :  { %376 = vmax.xlane.f32.xlu0 %v370_v43  ;;  %v518_v46 = vpop.f32.mrb[7].mxu0  ;;  %v373_v47 = vadd.f32 %v435_v41, %v372_v45 }
 0x2f4   :  { %378 = vmax.xlane.f32.xlu0 %v373_v47 }
 0x37d   :  { %v377_v48 = vpop.xlane.xlu0 %376 }
 0x37e   :  { %v380_v49 = vsub.f32 %v370_v43, %v377_v48 }
 0x380   :  { %v382_v50 = vmul.f32 1.442695, %v380_v49 }
 0x381   :  { %v379_v51 = vpop.xlane.xlu0 %378 }
 0x382   :  { %555 = vpow2.f32 %v382_v50  ;;  %v381_v52 = vsub.f32 %v373_v47, %v379_v51 }
 0x384   :  { %v384_v53 = vmul.f32 1.442695, %v381_v52 }
 0x386   :  { %557 = vpow2.f32 %v384_v53 }
 0x38c   :  { %v556_v54 = vpop.eup %555 }
 0x38d   :  { %386 = vadd.xlane.f32.xlu1 %v556_v54 }
 0x390   :  { %v558_v55 = vpop.eup %557 }
 0x391   :  { %388 = vadd.xlane.f32.xlu1 %v558_v55 }
 0x41a   :  { %v387_v56 = vpop.xlane.xlu1 %386 }
 0x41b   :  { %559 = vrcp.f32 %v387_v56 }
 0x41e   :  { %v389_v57 = vpop.xlane.xlu1 %388 }
 0x41f   :  { %561 = vrcp.f32 %v389_v57 }
 0x425   :  { %v560_v58 = vpop.eup %559 }
 0x426   :  { %v392_v60 = vmul.f32 %v560_v58, %v556_v54 }
 0x429   :  { %v562_v59 = vpop.eup %561 }
 0x42a   :  { %v393_v61 = vmul.f32 %v562_v59, %v558_v55 }
 0x42c   :  { %v451_v62 = vpack.c.bf16 %v393_v61, %v392_v60 }
 0x42e   :  { %452 = vst [vmem:[#allocation10] sm:$0xff] %v451_v62  }
 0x42f   :  { %662 = shalt.err (!%p659_p8)
}
 0x430   :  { %s663_s14 = scalar_lea.hbm %s850_s7, 128 }
 0x431   :  { %p664_p9 = scmp.ne.s32.totalorder %s850_s7, %s663_s14  ;;  %p667_p10 = scmp.lt.u32.totalorder %s663_s14, %s850_s7 }
 0x433   :  { %p669_p11 = pnand %p667_p10, %p664_p9 }
 0x435   :  { %672 = shalt.err (!%p669_p11)
}
 0x436   :  { %415 = dma.vmem_to_hbm [thread:$0]  %s410_s6, 128, %s850_s7, [#allocation4], %s682_s11, %s682_s11, %s683_s12  }
 0x437   :  { %679 = dma.done.wait [#allocation4], 128  }
 0x438   :  { %680 = vsyncadd [#allocation4], 4294967168 }
 0x439   :  { %419 = vsyncpa [#allocation3], 1 }
 0x43a   :  { %420 = vsyncpa [#allocation6], 1 }
 0x43b   :  { %421 = vsyncpa [#allocation9], 1 }
 0x43c   :  { %422 = vsyncpa [#allocation4], 1 }

</bundles_post_ra>
